<compile_context>
chip_gen: v5e
topology: v5e:2x2
jax: 0.10.0
libtpu: 0.0.40
codegen_flags: <defaults>
</compile_context>

<pallas_src>
import functools

import jax
import jax.numpy as jnp
from jax.experimental import pallas as pl
from jax.experimental.pallas import tpu as pltpu


def _round_up(a: int, b: int) -> int:
    return ((a + b - 1) // b) * b


def _vmem_budget_bytes() -> int:
    """~3/4 of the device's physical VMEM (v5e/v6e: 128 MiB, v7x: 64 MiB)."""
    try:
        cap = int(pltpu.get_tpu_info().vmem_capacity_bytes)
    except Exception:
        cap = 64 * 1024 * 1024          # conservative fallback = v7x physical VMEM
    return max(16 * 1024 * 1024, (cap * 3) // 4)


# --------------------- activation fake-quant pre-pass ------------------------

def _act_quant_kernel(x_ref, xq_ref, scale_ref):
    """Per-token dynamic symmetric int8 fake-quant for one [tm, K] tile."""
    x = x_ref[...].astype(jnp.float32)
    amax = jnp.max(jnp.abs(x), axis=-1, keepdims=True)
    scale = jnp.maximum(amax, 1e-8) / 127.0                   # [tm, 1]
    xq = jnp.clip(jnp.round(x / scale), -128.0, 127.0)
    scale_ref[...] = scale
    # Integer codes in [-128, 127] are exactly representable in bf16.
    xq_ref[...] = xq.astype(xq_ref.dtype)


def _act_quant(x_p, tm_q, compute_dtype, vmem_budget):
    M_pad, K_pad = x_p.shape
    x_b = x_p.dtype.itemsize
    c_b = jnp.dtype(compute_dtype).itemsize
    vmem_est = 2 * tm_q * K_pad * (x_b + c_b) + 2 * tm_q * 4
    vmem_limit = int(min(max(2 * vmem_est, 16 * 1024 * 1024), vmem_budget))

    return pl.pallas_call(
        _act_quant_kernel,
        out_shape=(jax.ShapeDtypeStruct((M_pad, K_pad), compute_dtype),
                   jax.ShapeDtypeStruct((M_pad, 1), jnp.float32)),
        grid_spec=pltpu.PrefetchScalarGridSpec(
            num_scalar_prefetch=0,
            grid=(M_pad // tm_q,),
            in_specs=[pl.BlockSpec((tm_q, K_pad), lambda i: (i, 0))],
            out_specs=[pl.BlockSpec((tm_q, K_pad), lambda i: (i, 0)),
                       pl.BlockSpec((tm_q, 1), lambda i: (i, 0))],
        ),
        compiler_params=pltpu.CompilerParams(
            dimension_semantics=("parallel",),
            vmem_limit_bytes=vmem_limit),
        cost_estimate=pl.CostEstimate(
            flops=4 * M_pad * K_pad,
            transcendentals=0,
            bytes_accessed=M_pad * K_pad * (x_b + c_b) + M_pad * 4),
    )(x_p)


# ----------------------------- tiled matmul ----------------------------------

def _fq_matmul_kernel(*refs, has_scale: bool, has_bias: bool):
    """One (tm, tn) output tile, accumulated over the K grid axis.

    refs: xq [tm, tk], w [tk, tn], (scale [tm, 1]), (bias [1, tn]),
          out [tm, tn], acc scratch [tm, tn] f32.
    """
    it = iter(refs)
    xq_ref = next(it)
    w_ref = next(it)
    scale_ref = next(it) if has_scale else None
    b_ref = next(it) if has_bias else None
    o_ref = next(it)
    acc_ref = next(it)

    k = pl.program_id(2)

    @pl.when(k == 0)
    def _():
        acc_ref[...] = jnp.zeros_like(acc_ref)

    # bf16 x bf16 -> f32 on the MXU; RHS already [K, N] so no transpose/relayout.
    acc_ref[...] += jnp.dot(xq_ref[...], w_ref[...],
                            preferred_element_type=jnp.float32)

    @pl.when(k == pl.num_programs(2) - 1)
    def _():
        y = acc_ref[...]
        if has_scale:
            y = y * scale_ref[...]           # per-token dequant scale [tm, 1]
        if has_bias:
            y = y + b_ref[...]               # [1, tn] f32
        o_ref[...] = y.astype(o_ref.dtype)


def efficient_fake_quant_linear(x, weight, bias=None, *, a_qdq: bool = True,
                                tm: int = 512, tn: int = 512, tk: int = 2048,
                                compute_dtype=jnp.bfloat16, out_dtype=None):
    """x: [..., K], weight: [N, K], bias: [N] or None -> [..., N]."""
    orig_shape = x.shape
    K = orig_shape[-1]
    N, Kw = weight.shape
    assert Kw == K, "weight must be [out_features, in_features]"

    out_dtype = x.dtype if out_dtype is None else out_dtype
    x2d = x.reshape(-1, K)
    M = x2d.shape[0]

    # ---- tile sizes (aligned: M to 16 for bf16 sublane packing, N/K to 128) --
    tm = _round_up(tm, 16)
    tn = _round_up(tn, 128)
    tk = _round_up(tk, 128)
    tm_eff = _round_up(min(tm, _round_up(M, 16)), 16)
    tn_eff = max(128, min(tn, _round_up(N, 128)))
    tk_eff = K if K <= tk else tk
    M_pad = _round_up(M, tm_eff)
    N_pad = _round_up(N, tn_eff)
    K_pad = _round_up(K, tk_eff)

    vmem_budget = _vmem_budget_bytes()
    x_b = x2d.dtype.itemsize
    c_b = jnp.dtype(compute_dtype).itemsize
    o_b = jnp.dtype(out_dtype).itemsize

    # Pre-pass M tile: must divide tm_eff (hence M_pad); shrink if full-K f32
    # rows would blow the VMEM budget on wide models.
    tm_q = tm_eff
    for cand in (256, 128, 64, 32, 16):
        if cand <= tm_eff and tm_eff % cand == 0:
            tm_q = cand
            break
    while tm_q > 16 and 2 * tm_q * K_pad * (x_b + c_b) > vmem_budget:
        tm_q //= 2

    # ---- operand preparation (one-time, outside the hot kernel) -------------
    pad_m, pad_k, pad_n = M_pad - M, K_pad - K, N_pad - N
    x_p = x2d if (pad_m == 0 and pad_k == 0) else jnp.pad(x2d, ((0, pad_m), (0, pad_k)))

    if a_qdq:
        xq, scale = _act_quant(x_p, tm_q, compute_dtype, vmem_budget)
    else:
        xq, scale = x_p.astype(compute_dtype), None

    # Cast weight to the bf16 MXU operand dtype once and pre-transpose to
    # [K, N] so the RHS block is lane-dense in N (no per-tile relayout).
    w_t = jnp.transpose(weight.astype(compute_dtype))
    if pad_k or pad_n:
        w_t = jnp.pad(w_t, ((0, pad_k), (0, pad_n)))

    has_scale = a_qdq
    has_bias = bias is not None

    inputs = [xq, w_t]
    in_specs = [
        pl.BlockSpec((tm_eff, tk_eff), lambda i, j, k: (i, k)),   # activations
        pl.BlockSpec((tk_eff, tn_eff), lambda i, j, k: (k, j)),   # weight [K, N]
    ]
    if has_scale:
        inputs.append(scale)
        in_specs.append(pl.BlockSpec((tm_eff, 1), lambda i, j, k: (i, 0)))
    if has_bias:
        b2d = bias.reshape(1, N).astype(jnp.float32)
        if pad_n:
            b2d = jnp.pad(b2d, ((0, 0), (0, pad_n)))
        inputs.append(b2d)
        in_specs.append(pl.BlockSpec((1, tn_eff), lambda i, j, k: (0, j)))

    kernel = functools.partial(_fq_matmul_kernel,
                               has_scale=has_scale, has_bias=has_bias)

    # VMEM: double-buffered input/output tiles + f32 accumulator, clamped to
    # the device budget (valid on v7x's 64 MiB as well as v5e/v6e's 128 MiB).
    vmem_est = (2 * tm_eff * tk_eff * c_b
                + 2 * tk_eff * tn_eff * c_b
                + 2 * tm_eff * tn_eff * o_b
                + tm_eff * tn_eff * 4
                + 2 * tm_eff * 4
                + 2 * tn_eff * 4)
    vmem_limit = int(min(max(2 * vmem_est, 32 * 1024 * 1024), vmem_budget))

    n_tiles_m = M_pad // tm_eff
    n_tiles_n = N_pad // tn_eff
    cost = pl.CostEstimate(
        flops=2 * M_pad * N_pad * K_pad,
        transcendentals=0,
        bytes_accessed=(M_pad * K_pad * c_b * n_tiles_n      # xq re-read per N tile
                        + K_pad * N_pad * c_b * n_tiles_m    # weight re-read per M tile
                        + M_pad * N_pad * o_b
                        + (M_pad * 4 * n_tiles_n if has_scale else 0)
                        + (N_pad * 4 * n_tiles_m if has_bias else 0)))

    out2d = pl.pallas_call(
        kernel,
        out_shape=jax.ShapeDtypeStruct((M_pad, N_pad), out_dtype),
        grid_spec=pltpu.PrefetchScalarGridSpec(
            num_scalar_prefetch=0,
            grid=(n_tiles_m, n_tiles_n, K_pad // tk_eff),
            in_specs=in_specs,
            out_specs=pl.BlockSpec((tm_eff, tn_eff), lambda i, j, k: (i, j)),
            scratch_shapes=[pltpu.VMEM((tm_eff, tn_eff), jnp.float32)],
        ),
        compiler_params=pltpu.CompilerParams(
            dimension_semantics=("parallel", "parallel", "arbitrary"),
            vmem_limit_bytes=vmem_limit),
        cost_estimate=cost,
    )(*inputs)

    out2d = out2d[:M, :N]
    return out2d.reshape(*orig_shape[:-1], N)


# ------------------------------- reference -----------------------------------

def _reference(x, weight, bias, a_qdq, compute_dtype=jnp.bfloat16):
    """Pure-JAX reference modelling the same math (bf16 MXU operands, f32 acc)."""
    xf = x.astype(jnp.float32)
    if a_qdq:
        amax = jnp.max(jnp.abs(xf), axis=-1, keepdims=True)
        scale = jnp.maximum(amax, 1e-8) / 127.0
        xop = jnp.clip(jnp.round(xf / scale), -128.0, 127.0)
    else:
        scale = None
        xop = xf
    xop = xop.astype(compute_dtype).astype(jnp.float32)
    w = weight.astype(compute_dtype).astype(jnp.float32)
    y = jnp.einsum('...k,nk->...n', xop, w)
    if scale is not None:
        y = y * scale
    if bias is not None:
        y = y + bias.astype(jnp.float32)
    return y.astype(x.dtype)


if __name__ == "__main__":
    key = jax.random.PRNGKey(0)
    kx, kw, kb = jax.random.split(key, 3)

    batch, seq, in_features, out_features = 2, 8, 32, 32

    x = jax.random.normal(kx, (batch, seq, in_features), dtype=jnp.float32)
    weight = jax.random.normal(kw, (out_features, in_features),
                               dtype=jnp.float32) * 0.1
    bias = jax.random.normal(kb, (out_features,), dtype=jnp.float32) * 0.01

    # Path 1: activation fake-quant + bias (typical llmc configuration).
    y = jax.block_until_ready(
        efficient_fake_quant_linear(x, weight, bias, a_qdq=True))
    y_ref = _reference(x, weight, bias, a_qdq=True)
    assert y.shape == (batch, seq, out_features)
    assert jnp.allclose(y, y_ref, atol=1e-2, rtol=1e-2), "mismatch (a_qdq=True)"

    # Path 2: a_qdq is None and bias is None (plain linear).
    y2 = jax.block_until_ready(
        efficient_fake_quant_linear(x, weight, None, a_qdq=False))
    y2_ref = _reference(x, weight, None, a_qdq=False)
    assert jnp.allclose(y2, y2_ref, atol=1e-2, rtol=1e-2), "mismatch (a_qdq=False)"

    print("KERNEL_OK")
</pallas_src>

<mosaic_0001>
module attributes {stable_mosaic.version = 11 : i64} {
  func.func @_act_quant_kernel(%arg0: i32, %arg1: memref<16x32xf32, #tpu.memory_space<vmem>>, %arg2: memref<16x32xbf16, #tpu.memory_space<vmem>>, %arg3: memref<16x1xf32, #tpu.memory_space<vmem>>) attributes {dimension_semantics = [#tpu.dimension_semantics<parallel>], iteration_bounds = array<i64: 1>, scalar_prefetch = 0 : i64, scratch_operands = 0 : i64, tpu.core_type = #tpu.core_type<tc>, window_params = [{transform_indices = @transform_0, window_bounds = array<i64: 16, 32>}, {transform_indices = @transform_1, window_bounds = array<i64: 16, 32>}, {transform_indices = @transform_2, window_bounds = array<i64: 16, 1>}]} {
    %c0 = arith.constant 0 : index
    %c0_0 = arith.constant 0 : index
    %0 = vector.load %arg1[%c0, %c0_0] : memref<16x32xf32, #tpu.memory_space<vmem>>, vector<16x32xf32>
    %1 = math.absf %0 : vector<16x32xf32>
    %cst = arith.constant dense<0xFF800000> : vector<16xf32>
    %2 = vector.multi_reduction <maximumf>, %1, %cst [1] : vector<16x32xf32> to vector<16xf32>
    %3 = vector.shape_cast %2 : vector<16xf32> to vector<16x1xf32>
    %cst_1 = arith.constant 9.99999993E-9 : f32
    %4 = vector.broadcast %cst_1 : f32 to vector<16x1xf32>
    %5 = arith.maximumf %3, %4 : vector<16x1xf32>
    %cst_2 = arith.constant 1.270000e+02 : f32
    %6 = vector.broadcast %cst_2 : f32 to vector<16x1xf32>
    %7 = arith.divf %5, %6 : vector<16x1xf32>
    %8 = vector.broadcast %7 : vector<16x1xf32> to vector<16x32xf32>
    %9 = arith.divf %0, %8 : vector<16x32xf32>
    %10 = math.roundeven %9 : vector<16x32xf32>
    %cst_3 = arith.constant -1.280000e+02 : f32
    %cst_4 = arith.constant 1.270000e+02 : f32
    %11 = vector.broadcast %cst_3 : f32 to vector<16x32xf32>
    %12 = arith.maximumf %11, %10 : vector<16x32xf32>
    %13 = vector.broadcast %cst_4 : f32 to vector<16x32xf32>
    %14 = arith.minimumf %13, %12 : vector<16x32xf32>
    %c0_5 = arith.constant 0 : index
    %c0_6 = arith.constant 0 : index
    %15 = vector.load %arg3[%c0_5, %c0_6] : memref<16x1xf32, #tpu.memory_space<vmem>>, vector<16x1xf32>
    tpu.vector_store %arg3[%c0_5, %c0_6], %7 {strides = array<i32>} : memref<16x1xf32, #tpu.memory_space<vmem>>, vector<16x1xf32>,
    %16 = arith.truncf %14 : vector<16x32xf32> to vector<16x32xbf16>
    %c0_7 = arith.constant 0 : index
    %c0_8 = arith.constant 0 : index
    %17 = vector.load %arg2[%c0_7, %c0_8] : memref<16x32xbf16, #tpu.memory_space<vmem>>, vector<16x32xbf16>
    tpu.vector_store %arg2[%c0_7, %c0_8], %16 {strides = array<i32>} : memref<16x32xbf16, #tpu.memory_space<vmem>>, vector<16x32xbf16>,
    return
  }
  func.func @transform_0(%arg0: i32) -> (i32, i32) {
    %c0_i32 = arith.constant 0 : i32
    %c0_i32_0 = arith.constant 0 : i32
    return %arg0, %c0_i32 : i32, i32
  }
  func.func @transform_1(%arg0: i32) -> (i32, i32) {
    %c0_i32 = arith.constant 0 : i32
    %c0_i32_0 = arith.constant 0 : i32
    return %arg0, %c0_i32 : i32, i32
  }
  func.func @transform_2(%arg0: i32) -> (i32, i32) {
    %c0_i32 = arith.constant 0 : i32
    %c0_i32_0 = arith.constant 0 : i32
    return %arg0, %c0_i32 : i32, i32
  }
}

</mosaic_0001>

<bundles_post_ra>
// kernel: tpu_custom_call.1
= control target key start
LH: loop header
LB: loop body
LE: loop exit
PB: predicated region body
PF: predicated region fallthrough
CT: control target
= control target key end

     0   :  { %8 = vsyncpa [#allocation3], 0  ;;  %s231_s0 = inlined_call_operand.hbm [shape: f32[16,32], index: 0, kind: input, shape index: {}]   ;;  %s232_s1 = inlined_call_operand.hbm [shape: bf16[16,32], index: 1, kind: output, shape index: {0}]   ;;  %s233_s2 = inlined_call_operand.vmem [shape: f32[16,1], index: 2, kind: output, shape index: {1}]  }
   0x1   :  { %9 = vsyncpa [#allocation4], 0  ;;  %s14_s11 = sshll.u32 %s231_s0, 4  ;;  %s197_s12 = smov [#allocation2]   ;;  %s15_s11 = int_to_ptr.hbm [resolvable:$true] %s14_s11 }
   0x2   :  { %s16_s13 = sshll.u32 %s197_s12, 4  ;;  %s198_s14 = smov 128   ;;  %s17_s13 = int_to_ptr.vmem [resolvable:$true] %s16_s13 }
   0x3   :  { %s199_s15 = smov 8  }
   0x4   :  { %22 = dma.hbm_to_vmem [thread:$0]  %s15_s11, 256, %s17_s13, [#allocation3], %s198_s14, %s198_s14, %s199_s15  }
   0x5   :  { %193 = dma.done.wait [#allocation3], 256  }
   0x6   :  { %194 = vsyncadd [#allocation3], 4294967040  ;;  %v27_v0 = vld [vmem:[#allocation2] sm:$0xff]  ;;  %vm31_vm0 = vcmask 261120   ;;  %v28_v2 = vld [vmem:[#allocation2 + $0x8] sm:$0xff]  ;;  %v200_v6 = vmov 127.0  }
   0x7   :  { %v29_v1 = vand.u32 2147483647, %v27_v0  ;;  %v30_v4 = vand.u32 2147483647, %v28_v2  ;;  %139 = vrcp.f32 %v200_v6  ;;  %vm85_vm2 = vcmask 7168   ;;  %s99_s22 = sshll.u32 %s232_s1, 4  ;;  %s100_s22 = int_to_ptr.hbm [resolvable:$true] %s99_s22 }
   0x8   :  { %vm90_vm12 = vcmask 257024   ;;  %s202_s23 = smov 64   ;;  %s203_s24 = smov 4  }
   0x9   :  { %v32_v3 = vsel %vm31_vm0, %v29_v1, -inf  ;;  %v35_v5 = vsel %vm31_vm0, %v30_v4, -inf }
   0xa   :  { %33 = vmax.xlane.f32.xlu0 %v32_v3 }
   0xd   :  { %v140_v7 = vpop.eup %139 }
   0xe   :  { %v41_v8 = vmul.f32 127.0, %v140_v7  ;;  %vm45_vm1 = vweird.f32 %v140_v7 }
  0x10   :  { %v42_v9 = vsub.f32 1.0, %v41_v8 }
  0x12   :  { %36 = vmax.xlane.f32.xlu0 %v35_v5  ;;  %v43_v10 = vmul.f32 %v140_v7, %v42_v9 }
  0x14   :  { %v44_v11 = vadd.f32 %v140_v7, %v43_v10 }
  0x16   :  { %v46_v12 = vsel %vm45_vm1, %v140_v7, %v44_v11 }
  0x7d   :  { %v34_v13 = vpop.xlane.xlu0 %33 }
  0x7e   :  { %v38_v14 = vmax.f32 %v34_v13, 1e-08 }
  0x80   :  { %v47_v15 = vmul.f32 %v46_v12, %v38_v14 }
  0x82   :  { %141 = vrcp.f32 %v47_v15  ;;  %86 = vst.msk [vmem:[%s233_s2] sm:$0xff] %vm85_vm2, %v47_v15  ;;  %v60_v22 = vand.u32 2147483648, %v47_v15  ;;  %v58_v24 = vand.u32 2147483647, %v47_v15  ;;  %vm54_vm4 = vweird.f32 %v47_v15 }
  0x84   :  { %v61_v27 = vor.u32 1.1754944e-38, %v60_v22  ;;  %vm59_vm6 = vcmp.eq.f32.partialorder %v58_v24, 8.507059e+37 }
  0x85   :  { %v37_v16 = vpop.xlane.xlu0 %36 }
  0x86   :  { %v39_v17 = vmax.f32 %v37_v16, 1e-08 }
  0x88   :  { %v142_v18 = vpop.eup %141  ;;  %v48_v19 = vmul.f32 %v46_v12, %v39_v17 }
  0x89   :  { %v50_v20 = vmul.f32 %v142_v18, %v47_v15  ;;  %vm55_vm3 = vweird.f32 %v142_v18 }
  0x8a   :  { %143 = vrcp.f32 %v48_v19  ;;  %87 = vst.msk [vmem:[%s233_s2 + $0x8] sm:$0xff] %vm85_vm2, %v48_v19  ;;  %vm56_vm5 = vmor %vm54_vm4, %vm55_vm3  ;;  %v75_v33 = vand.u32 2147483648, %v48_v19  ;;  %v73_v35 = vand.u32 2147483647, %v48_v19  ;;  %vm69_vm8 = vweird.f32 %v48_v19  ;;  %s201_s2 = smov [#allocation5]  }
  0x8b   :  { %v51_v21 = vsub.f32 1.0, %v50_v20  ;;  %s97_s19 = sshll.u32 %s201_s2, 4  ;;  %s98_s19 = int_to_ptr.vmem [resolvable:$true] %s97_s19 }
  0x8c   :  { %v76_v39 = vor.u32 1.1754944e-38, %v75_v33  ;;  %vm74_vm10 = vcmp.eq.f32.partialorder %v73_v35, 8.507059e+37 }
  0x8d   :  { %v52_v23 = vmul.f32 %v142_v18, %v51_v21 }
  0x8f   :  { %v53_v25 = vadd.f32 %v142_v18, %v52_v23 }
  0x90   :  { %v144_v26 = vpop.eup %143 }
  0x91   :  { %v57_v28 = vsel %vm56_vm5, %v142_v18, %v53_v25  ;;  %v65_v29 = vmul.f32 %v144_v26, %v48_v19  ;;  %vm70_vm7 = vweird.f32 %v144_v26 }
  0x92   :  { %v62_v30 = vsel %vm59_vm6, %v61_v27, %v57_v28  ;;  %vm71_vm9 = vmor %vm69_vm8, %vm70_vm7 }
  0x93   :  { %v63_v31 = vmul.f32 %v62_v30, %v27_v0  ;;  %v66_v32 = vsub.f32 1.0, %v65_v29 }
  0x95   :  { %v67_v34 = vmul.f32 %v144_v26, %v66_v32  ;;  %v118_v36 = vcvt.f32.s32 %v63_v31  ;;  %v116_v40 = vand.u32 2147483647, %v63_v31  ;;  %v121_v43 = vand.u32 2147483648, %v63_v31 }
  0x97   :  { %v68_v37 = vadd.f32 %v144_v26, %v67_v34  ;;  %v119_v38 = vcvt.s32.f32 %v118_v36  ;;  %vm117_vm11 = vcmp.lt.f32.partialorder %v116_v40, 8388608.0 }
  0x99   :  { %v72_v41 = vsel %vm71_vm9, %v144_v26, %v68_v37  ;;  %v120_v42 = vand.u32 2147483647, %v119_v38 }
  0x9a   :  { %v77_v44 = vsel %vm74_vm10, %v76_v39, %v72_v41 }
  0x9b   :  { %v78_v45 = vmul.f32 %v77_v44, %v28_v2  ;;  %v122_v46 = vor.u32 %v121_v43, %v120_v42 }
  0x9d   :  { %v123_v47 = vsel %vm117_vm11, %v122_v46, %v63_v31  ;;  %v126_v48 = vcvt.f32.s32 %v78_v45  ;;  %v124_v51 = vand.u32 2147483647, %v78_v45  ;;  %v129_v54 = vand.u32 2147483648, %v78_v45 }
  0x9e   :  { %v81_v49 = vmax.f32 %v123_v47, -128.0 }
  0x9f   :  { %v127_v50 = vcvt.s32.f32 %v126_v48  ;;  %vm125_vm13 = vcmp.lt.f32.partialorder %v124_v51, 8388608.0 }
  0xa0   :  { %v83_v52 = vmin.f32 %v81_v49, 127.0 }
  0xa1   :  { %v128_v53 = vand.u32 2147483647, %v127_v50 }
  0xa2   :  { %v88_v55 = vpack.c.bf16 %v83_v52, %v83_v52 }
  0xa3   :  { %v130_v56 = vor.u32 %v129_v54, %v128_v53 }
  0xa4   :  { %91 = vst.msk [vmem:[#allocation5] sm:$0xf] %vm90_vm12, %v88_v55 }
  0xa5   :  { %v131_v57 = vsel %vm125_vm13, %v130_v56, %v78_v45 }
  0xa6   :  { %v82_v58 = vmax.f32 %v131_v57, -128.0 }
  0xa8   :  { %v84_v59 = vmin.f32 %v82_v58, 127.0 }
  0xaa   :  { %v89_v60 = vpack.c.bf16 %v84_v59, %v84_v59 }
  0xac   :  { %92 = vst.msk [vmem:[#allocation5 + $0x4] sm:$0xf] %vm90_vm12, %v89_v60 }
  0xad   :  { %105 = dma.vmem_to_hbm [thread:$0]  %s98_s19, 128, %s100_s22, [#allocation4], %s202_s23, %s202_s23, %s203_s24  }
  0xae   :  { %195 = dma.done.wait [#allocation4], 128  }
  0xaf   :  { %196 = vsyncadd [#allocation4], 4294967168 }
  0xb0   :  { %114 = vsyncpa [#allocation3], 1 }
  0xb1   :  { %115 = vsyncpa [#allocation4], 1 }

</bundles_post_ra>
